<compile_context>
chip_gen: v5e
topology: v5e:2x2
jax: 0.10.0
libtpu: 0.0.40
codegen_flags: <defaults>
</compile_context>

<pallas_src>
import functools

import jax
import jax.numpy as jnp
from jax.experimental import pallas as pl
from jax.experimental.pallas import tpu as pltpu

H1, H2, O = 64, 32, 1


def _round_up(x, m):
    return ((x + m - 1) // m) * m


@functools.lru_cache(maxsize=None)
def _vmem_capacity_bytes():
    """Per-TensorCore VMEM capacity; falls back to the tightest budget (v7x)."""
    try:
        return int(pltpu.get_tpu_info().vmem_capacity_bytes)
    except Exception:
        return 64 << 20


def _mlp_epilogue(h1, w2_ref, b2_ref, w3t_ref, b3_ref, o_ref):
    # Layer 2 (64 -> 32): tiny MXU matmul, f32 accumulation.
    h2 = jnp.dot(h1.astype(w2_ref.dtype), w2_ref[...],
                 preferred_element_type=jnp.float32) + b2_ref[...]
    h2 = jnp.maximum(h2, 0.0)
    # Layer 3 (32 -> 1): VPU multiply + XLU lane reduce.  An MXU matmul with
    # N=1 would burn a full vmatmul push for <1% lane utilization.
    y = jnp.sum(h2 * w3t_ref[...], axis=-1, keepdims=True) + b3_ref[...]
    # NOTE: (bb, 1) column store (masked vst) kept deliberately — output bytes
    # are tiny vs. the x stream and the epilogue hides under the next x DMA.
    o_ref[...] = y.astype(o_ref.dtype)


def mlp_kernel(x_ref, w1_ref, b1_ref, w2_ref, b2_ref, w3t_ref, b3_ref,
               o_ref, *scratch, nk, tk, w1_resident):
    # f32 -> bf16 cast inside the kernel (free VPU slot); avoids a wrapper-side
    # XLA convert that would add a full extra HBM pass over x.
    x = x_ref[...]
    if x.dtype != jnp.bfloat16:
        x = x.astype(jnp.bfloat16)

    if nk == 1:
        # Single-K specialization: no VMEM accumulator round-trip.
        h1 = jnp.dot(x, w1_ref[...], preferred_element_type=jnp.float32)
        h1 = jnp.maximum(h1 + b1_ref[...], 0.0)
        _mlp_epilogue(h1, w2_ref, b2_ref, w3t_ref, b3_ref, o_ref)
        return

    acc_ref = scratch[0]
    k = pl.program_id(1)

    @pl.when(k == 0)
    def _():
        acc_ref[...] = jnp.zeros_like(acc_ref)

    if w1_resident:
        # W1 lives fully in VMEM; take the current K tile with a cheap
        # sublane-dim slice (start is tk-aligned, tk is a multiple of 128 here).
        start = pl.multiple_of(k * tk, tk)
        w1_blk = w1_ref[pl.ds(start, tk), :]
    else:
        w1_blk = w1_ref[...]

    # Layer 1 partial product: bf16 operands, f32 accumulation on the MXU.
    acc_ref[...] += jnp.dot(x, w1_blk, preferred_element_type=jnp.float32)

    @pl.when(k == nk - 1)
    def _():
        h1 = jnp.maximum(acc_ref[...] + b1_ref[...], 0.0)
        _mlp_epilogue(h1, w2_ref, b2_ref, w3t_ref, b3_ref, o_ref)


def _choose_dims(D):
    """Returns (Dp, tk): padded reduction dim and layer-1 K tile."""
    if D <= 1024:
        return D, D                      # single K step; full-dim block needs no 128-align
    Dp = _round_up(D, 128)               # pad instead of one giant un-tiled K block
    for tk in (1024, 512, 256, 128):
        if Dp % tk == 0:
            return Dp, tk
    return Dp, 128                       # unreachable (Dp is a multiple of 128)


def _choose_block_b(B, tk, x_elem_bytes, x_buf_target, requested):
    """Batch tile: target x_buf_target bytes per x buffer, 16-row aligned."""
    bb = x_buf_target // (tk * x_elem_bytes)
    bb = max(512, min(bb, 4096))
    if requested is not None:
        bb = min(bb, _round_up(requested, 16))
    bb = min(bb, _round_up(B, 16))
    bb = max(16, (bb // 16) * 16)
    # v7x megacore: keep the batch-parallel axis even so both TensorCores get
    # equal work (harmless on single-TC v5e/v6e).
    nb = pl.cdiv(B, bb)
    if nb > 1 and nb % 2 == 1:
        bb_even = max(16, _round_up(pl.cdiv(B, nb + 1), 16))
        if pl.cdiv(B, bb_even) % 2 == 0:
            bb = bb_even
    return bb


@functools.partial(jax.jit, static_argnames=("block_b",))
def mlp_forward(x, w1, b1, w2, b2, w3, b3, *, block_b=None):
    """x: (B, D); w1: (D, 64); w2: (64, 32); w3: (32, 1); biases broadcastable (1, n)."""
    B, D = x.shape
    assert w1.shape == (D, H1) and w2.shape == (H1, H2) and w3.shape == (H2, O)

    if x.dtype not in (jnp.bfloat16, jnp.float32):
        x = x.astype(jnp.float32)
    out_dtype = x.dtype

    Dp, tk = _choose_dims(D)
    if Dp != D:
        # Rare path (large, non-128-aligned D): zero-pad the reduction dim so K
        # stays lane-aligned and tileable.  Costs one extra pass over x.
        x = jnp.pad(x, ((0, 0), (0, Dp - D)))
        w1 = jnp.pad(w1, ((0, Dp - D), (0, 0)))

    x_elem_bytes = 2 if x.dtype == jnp.bfloat16 else 4

    # Generation-aware budgets.
    vmem_cap = _vmem_capacity_bytes()
    if vmem_cap >= (100 << 20):          # v5e / v6e: 128 MiB VMEM per TensorCore
        x_buf_target, w1_res_cap, vmem_ceiling = 8 << 20, 16 << 20, 64 << 20
    else:                                # v7x: 64 MiB VMEM per TensorCore
        x_buf_target, w1_res_cap, vmem_ceiling = 4 << 20, 8 << 20, 40 << 20

    bb = _choose_block_b(B, tk, x_elem_bytes, x_buf_target, block_b)
    nb = pl.cdiv(B, bb)
    nk = Dp // tk

    w1_bytes = Dp * H1 * 2
    w1_resident = w1_bytes <= w1_res_cap

    # Weights / biases are tiny: cast once in the wrapper.  x is deliberately
    # NOT cast here (see kernel).
    w1 = w1.astype(jnp.bfloat16)
    w2 = w2.astype(jnp.bfloat16)
    w3t = w3.reshape(H2, O).T.astype(jnp.float32)   # (1, H2): consumed on the VPU
    b1 = b1.reshape(1, H1).astype(jnp.float32)
    b2 = b2.reshape(1, H2).astype(jnp.float32)
    b3 = b3.reshape(1, O).astype(jnp.float32)

    const = pl.Buffered(1)               # never re-fetched -> single buffer
    if w1_resident:
        w1_spec = pl.BlockSpec((Dp, H1), lambda i, k: (0, 0), pipeline_mode=const)
        w1_vmem = w1_bytes
    else:
        # TODO(synk): for extremely large D, W1 streams per batch tile; a manual
        # pipeline could share it across batch tiles, but this path is rare.
        w1_spec = pl.BlockSpec((tk, H1), lambda i, k: (k, 0))
        w1_vmem = 2 * tk * H1 * 2

    out_bytes = jnp.dtype(out_dtype).itemsize
    vmem_est = (2 * bb * tk * x_elem_bytes          # double-buffered x tiles
                + w1_vmem                           # W1 (resident or streamed)
                + (64 << 10)                        # small constants + padding
                + 2 * bb * O * out_bytes            # double-buffered out tiles
                + (bb * H1 * 4 if nk > 1 else 0)    # layer-1 f32 accumulator
                + bb * (H1 + H2) * 4)               # epilogue temporaries
    vmem_limit = int(min(max(vmem_est * 3 // 2 + (2 << 20), 8 << 20), vmem_ceiling))

    flops = 2 * B * (Dp * H1 + H1 * H2 + H2 * O)
    bytes_accessed = (B * Dp * x_elem_bytes
                      + w1_bytes * (1 if w1_resident else nb)
                      + H1 * H2 * 2 + (H1 + 2 * H2 + O) * 4
                      + B * O * out_bytes)

    kernel = functools.partial(mlp_kernel, nk=nk, tk=tk, w1_resident=w1_resident)

    return pl.pallas_call(
        kernel,
        out_shape=jax.ShapeDtypeStruct((B, O), out_dtype),
        grid_spec=pltpu.PrefetchScalarGridSpec(
            num_scalar_prefetch=0,
            grid=(nb, nk),
            in_specs=[
                pl.BlockSpec((bb, tk), lambda i, k: (i, k)),               # x tile
                w1_spec,                                                   # W1
                pl.BlockSpec((1, H1), lambda i, k: (0, 0),
                             pipeline_mode=const),                         # b1
                pl.BlockSpec((H1, H2), lambda i, k: (0, 0),
                             pipeline_mode=const),                         # W2
                pl.BlockSpec((1, H2), lambda i, k: (0, 0),
                             pipeline_mode=const),                         # b2
                pl.BlockSpec((1, H2), lambda i, k: (0, 0),
                             pipeline_mode=const),                         # W3^T
                pl.BlockSpec((1, O), lambda i, k: (0, 0),
                             pipeline_mode=const),                         # b3
            ],
            out_specs=pl.BlockSpec((bb, O), lambda i, k: (i, 0)),
            scratch_shapes=([pltpu.VMEM((bb, H1), jnp.float32)] if nk > 1 else []),
        ),
        compiler_params=pltpu.CompilerParams(
            dimension_semantics=("parallel", "arbitrary"),
            vmem_limit_bytes=vmem_limit,
        ),
        cost_estimate=pl.CostEstimate(
            flops=flops, transcendentals=0, bytes_accessed=bytes_accessed),
    )(x, w1, b1, w2, b2, w3t, b3)


def init_params(key, input_dim):
    """Deterministic init mimicking nn.Linear's U(-1/sqrt(fan_in), 1/sqrt(fan_in)).

    PyTorch stores Linear weights as (out, in); we keep them as (in, out) so the
    kernel computes x @ W + b without a per-call transpose.
    """
    dims = [(input_dim, H1), (H1, H2), (H2, O)]
    params = []
    for (fan_in, fan_out) in dims:
        key, kw, kb = jax.random.split(key, 3)
        bound = 1.0 / (fan_in ** 0.5)
        w = jax.random.uniform(kw, (fan_in, fan_out), jnp.float32, -bound, bound)
        b = jax.random.uniform(kb, (1, fan_out), jnp.float32, -bound, bound)
        params.extend([w, b])
    return params


if __name__ == "__main__":
    key = jax.random.PRNGKey(0)
    key, kx = jax.random.split(key)

    batch = 64
    input_dim = 32
    x = jax.random.normal(kx, (batch, input_dim), jnp.float32)

    w1, b1, w2, b2, w3, b3 = init_params(key, input_dim)

    # block_b=16 -> a 4-step "parallel" batch grid (exercises the pipeline; on
    # v7x the even step count shards cleanly across both TensorCores).
    out = mlp_forward(x, w1, b1, w2, b2, w3, b3, block_b=16)
    out = jax.block_until_ready(out)

    # Pure-JAX f32 reference (kernel does layer matmuls in bf16 -> relaxed tol).
    h = jnp.maximum(x @ w1 + b1, 0.0)
    h = jnp.maximum(h @ w2 + b2, 0.0)
    ref = h @ w3 + b3
    assert out.shape == (batch, O)
    assert jnp.allclose(out, ref, atol=5e-2, rtol=5e-2), float(jnp.max(jnp.abs(out - ref)))

    print("KERNEL_OK")
</pallas_src>

<mosaic_0001>
module attributes {stable_mosaic.version = 11 : i64} {
  func.func @mlp_kernel(%arg0: i32, %arg1: i32, %arg2: memref<16x32xf32, #tpu.memory_space<vmem>>, %arg3: memref<32x64xbf16, #tpu.memory_space<vmem>>, %arg4: memref<1x64xf32, #tpu.memory_space<vmem>>, %arg5: memref<64x32xbf16, #tpu.memory_space<vmem>>, %arg6: memref<1x32xf32, #tpu.memory_space<vmem>>, %arg7: memref<1x32xf32, #tpu.memory_space<vmem>>, %arg8: memref<1x1xf32, #tpu.memory_space<vmem>>, %arg9: memref<16x1xf32, #tpu.memory_space<vmem>>) attributes {dimension_semantics = [#tpu.dimension_semantics<parallel>, #tpu.dimension_semantics<arbitrary>], iteration_bounds = array<i64: 4, 1>, scalar_prefetch = 0 : i64, scratch_operands = 0 : i64, tpu.core_type = #tpu.core_type<tc>, window_params = [{transform_indices = @transform_0, window_bounds = array<i64: 16, 32>}, {pipeline_mode = #tpu.pipeline_mode<synchronous>, transform_indices = @transform_1, window_bounds = array<i64: 32, 64>}, {pipeline_mode = #tpu.pipeline_mode<synchronous>, transform_indices = @transform_2, window_bounds = array<i64: 1, 64>}, {pipeline_mode = #tpu.pipeline_mode<synchronous>, transform_indices = @transform_3, window_bounds = array<i64: 64, 32>}, {pipeline_mode = #tpu.pipeline_mode<synchronous>, transform_indices = @transform_4, window_bounds = array<i64: 1, 32>}, {pipeline_mode = #tpu.pipeline_mode<synchronous>, transform_indices = @transform_5, window_bounds = array<i64: 1, 32>}, {pipeline_mode = #tpu.pipeline_mode<synchronous>, transform_indices = @transform_6, window_bounds = array<i64: 1, 1>}, {transform_indices = @transform_7, window_bounds = array<i64: 16, 1>}]} {
    %c0 = arith.constant 0 : index
    %c0_0 = arith.constant 0 : index
    %0 = vector.load %arg2[%c0, %c0_0] : memref<16x32xf32, #tpu.memory_space<vmem>>, vector<16x32xf32>
    %1 = arith.truncf %0 : vector<16x32xf32> to vector<16x32xbf16>
    %c0_1 = arith.constant 0 : index
    %c0_2 = arith.constant 0 : index
    %2 = vector.load %arg3[%c0_1, %c0_2] : memref<32x64xbf16, #tpu.memory_space<vmem>>, vector<32x64xbf16>
    %cst = arith.constant dense<0.000000e+00> : vector<16x64xf32>
    %3 = tpu.matmul %1, %2, %cst {dimension_numbers = #tpu.dot_dimension_numbers<[1], [0], [0], [1], [0, 0, 1, 1], [], []>} : vector<16x32xbf16>, vector<32x64xbf16>, vector<16x64xf32> -> vector<16x64xf32>
    %c0_3 = arith.constant 0 : index
    %c0_4 = arith.constant 0 : index
    %4 = vector.load %arg4[%c0_3, %c0_4] : memref<1x64xf32, #tpu.memory_space<vmem>>, vector<1x64xf32>
    %5 = vector.broadcast %4 : vector<1x64xf32> to vector<16x64xf32>
    %6 = arith.addf %3, %5 : vector<16x64xf32>
    %cst_5 = arith.constant 0.000000e+00 : f32
    %7 = vector.broadcast %cst_5 : f32 to vector<16x64xf32>
    %8 = arith.maximumf %6, %7 : vector<16x64xf32>
    %9 = arith.truncf %8 : vector<16x64xf32> to vector<16x64xbf16>
    %c0_6 = arith.constant 0 : index
    %c0_7 = arith.constant 0 : index
    %10 = vector.load %arg5[%c0_6, %c0_7] : memref<64x32xbf16, #tpu.memory_space<vmem>>, vector<64x32xbf16>
    %cst_8 = arith.constant dense<0.000000e+00> : vector<16x32xf32>
    %11 = tpu.matmul %9, %10, %cst_8 {dimension_numbers = #tpu.dot_dimension_numbers<[1], [0], [0], [1], [0, 0, 1, 1], [], []>} : vector<16x64xbf16>, vector<64x32xbf16>, vector<16x32xf32> -> vector<16x32xf32>
    %c0_9 = arith.constant 0 : index
    %c0_10 = arith.constant 0 : index
    %12 = vector.load %arg6[%c0_9, %c0_10] : memref<1x32xf32, #tpu.memory_space<vmem>>, vector<1x32xf32>
    %13 = vector.broadcast %12 : vector<1x32xf32> to vector<16x32xf32>
    %14 = arith.addf %11, %13 : vector<16x32xf32>
    %cst_11 = arith.constant 0.000000e+00 : f32
    %15 = vector.broadcast %cst_11 : f32 to vector<16x32xf32>
    %16 = arith.maximumf %14, %15 : vector<16x32xf32>
    %c0_12 = arith.constant 0 : index
    %c0_13 = arith.constant 0 : index
    %17 = vector.load %arg7[%c0_12, %c0_13] : memref<1x32xf32, #tpu.memory_space<vmem>>, vector<1x32xf32>
    %18 = vector.broadcast %17 : vector<1x32xf32> to vector<16x32xf32>
    %19 = arith.mulf %16, %18 : vector<16x32xf32>
    %cst_14 = arith.constant dense<0.000000e+00> : vector<16xf32>
    %20 = vector.multi_reduction <add>, %19, %cst_14 [1] : vector<16x32xf32> to vector<16xf32>
    %21 = vector.shape_cast %20 : vector<16xf32> to vector<16x1xf32>
    %c0_15 = arith.constant 0 : index
    %c0_16 = arith.constant 0 : index
    %22 = vector.load %arg8[%c0_15, %c0_16] : memref<1x1xf32, #tpu.memory_space<vmem>>, vector<1x1xf32>
    %23 = vector.broadcast %22 : vector<1x1xf32> to vector<16x1xf32>
    %24 = arith.addf %21, %23 : vector<16x1xf32>
    %c0_17 = arith.constant 0 : index
    %c0_18 = arith.constant 0 : index
    %25 = vector.load %arg9[%c0_17, %c0_18] : memref<16x1xf32, #tpu.memory_space<vmem>>, vector<16x1xf32>
    tpu.vector_store %arg9[%c0_17, %c0_18], %24 {strides = array<i32>} : memref<16x1xf32, #tpu.memory_space<vmem>>, vector<16x1xf32>,
    return
  }
  func.func @transform_0(%arg0: i32, %arg1: i32) -> (i32, i32) {
    %c0_i32 = arith.constant 0 : i32
    return %arg0, %arg1 : i32, i32
  }
  func.func @transform_1(%arg0: i32, %arg1: i32) -> (i32, i32) {
    %c0_i32 = arith.constant 0 : i32
    %c0_i32_0 = arith.constant 0 : i32
    %c0_i32_1 = arith.constant 0 : i32
    return %c0_i32, %c0_i32_0 : i32, i32
  }
  func.func @transform_2(%arg0: i32, %arg1: i32) -> (i32, i32) {
    %c0_i32 = arith.constant 0 : i32
    %c0_i32_0 = arith.constant 0 : i32
    %c0_i32_1 = arith.constant 0 : i32
    return %c0_i32, %c0_i32_0 : i32, i32
  }
  func.func @transform_3(%arg0: i32, %arg1: i32) -> (i32, i32) {
    %c0_i32 = arith.constant 0 : i32
    %c0_i32_0 = arith.constant 0 : i32
    %c0_i32_1 = arith.constant 0 : i32
    return %c0_i32, %c0_i32_0 : i32, i32
  }
  func.func @transform_4(%arg0: i32, %arg1: i32) -> (i32, i32) {
    %c0_i32 = arith.constant 0 : i32
    %c0_i32_0 = arith.constant 0 : i32
    %c0_i32_1 = arith.constant 0 : i32
    return %c0_i32, %c0_i32_0 : i32, i32
  }
  func.func @transform_5(%arg0: i32, %arg1: i32) -> (i32, i32) {
    %c0_i32 = arith.constant 0 : i32
    %c0_i32_0 = arith.constant 0 : i32
    %c0_i32_1 = arith.constant 0 : i32
    return %c0_i32, %c0_i32_0 : i32, i32
  }
  func.func @transform_6(%arg0: i32, %arg1: i32) -> (i32, i32) {
    %c0_i32 = arith.constant 0 : i32
    %c0_i32_0 = arith.constant 0 : i32
    %c0_i32_1 = arith.constant 0 : i32
    return %c0_i32, %c0_i32_0 : i32, i32
  }
  func.func @transform_7(%arg0: i32, %arg1: i32) -> (i32, i32) {
    %c0_i32 = arith.constant 0 : i32
    %c0_i32_0 = arith.constant 0 : i32
    return %arg0, %c0_i32 : i32, i32
  }
}

</mosaic_0001>

<bundles_post_ra>
// kernel: mlp_forward.1
= control target key start
LH: loop header
LB: loop body
LE: loop exit
PB: predicated region body
PF: predicated region fallthrough
CT: control target
= control target key end

     0   :  { %s635_s26 = smov 0   ;;  %s637_s27 = smov 0   ;;  %s705_s0 = inlined_call_operand.vmem [shape: f32[64,32], index: 0, kind: input, shape index: {}]   ;;  %s706_s1 = inlined_call_operand.vmem [shape: bf16[32,64], index: 1, kind: input, shape index: {}]   ;;  %s707_s2 = inlined_call_operand.vmem [shape: f32[1,64], index: 2, kind: input, shape index: {}]   ;;  %s708_s3 = inlined_call_operand.vmem [shape: bf16[64,32], index: 3, kind: input, shape index: {}]   ;;  %s709_s4 = inlined_call_operand.vmem [shape: f32[1,32], index: 4, kind: input, shape index: {}]   ;;  %s710_s5 = inlined_call_operand.vmem [shape: f32[1,32], index: 5, kind: input, shape index: {}]   ;;  %s711_s6 = inlined_call_operand.<no memory space> [shape: f32[1,1], index: 6, kind: input, shape index: {}]   ;;  %s712_s7 = inlined_call_operand.vmem [shape: f32[64,1], index: 7, kind: output, shape index: {}]  }
   0x1   :  { %v12_v0 = vstv %s711_s6  ;;  %s639_s28 = smov 0  }
   0x2   :  { %13 = vst [vmem:[#allocation2] sm:$0x1] %v12_v0 }
   0x3 LB: > { %s31_s6 = sadd.s32 1, %s586_s27  ;;  %p501_p0 = scmp.ge.s32.totalorder %s590_s28, 1  ;;  %s590_s28 = sphi %s639_s28, %s19_s28   ;;  %s586_s27 = sphi %s637_s27, %s714_s27   ;;  %s582_s26 = sphi %s635_s26, %s713_s26  }
   0x4   : > { %p33_p1 = scmp.ge.s32.totalorder %s31_s6, 4  ;;  %p257_p2 = scmp.lt.s32.totalorder %s590_s28, 5 }
   0x6   : > { %s716_s6 = smov (%p33_p1, %s31_s6), 0  ;;  %p258_p3 = pnand %p501_p0, %p257_p2 }
   0x7   : > { %s502_s8 = sshll.u32 (!%p258_p3), %s582_s26, 1 }
   0x8   : > { %261 = sbr.rel (%p258_p3) target bundleno = 421 (0x1a5), region = 48  ;;  %p293_p4 = scmp.lt.s32.totalorder (!%p258_p3), %s502_s8, 7 }
   0xd   : > { %v535_v1 = vld [vmem:[%s706_s1 + $0x8] sm:$0xff]  ;;  %v534_v2 = vld [vmem:[%s706_s1] sm:$0xff]  ;;  %s718_s8 = smov (!%p293_p4, %s502_s8), 7  ;;  %vm331_vm0 = vcmask 261120   ;;  %v539_v6 = vld [vmem:[%s708_s3 + $0x18] sm:$0xff]  ;;  %vm388_vm1 = vcmask 523264  }
   0xe   : > { %341 = vmatpush.bf16.msra.mxu0 %v535_v1  ;;  %s503_s11 = sshll.u32 %s718_s8, 3  ;;  %396 = vmatpush.bf16.msra.mxu1 %v539_v6  ;;  %v538_v7 = vld [vmem:[%s708_s3 + $0x10] sm:$0xff]  ;;  %v537_v8 = vld [vmem:[%s708_s3 + $0x8] sm:$0xff]  ;;  %v536_v9 = vld [vmem:[%s708_s3] sm:$0xff]  ;;  %vm426_vm2 = vcmask 7168  }
   0xf   : > { %s299_s14 = scalar_lea.vmem %s705_s0, %s503_s11  ;;  %v564_v11 = vld [vmem:[%s707_s2] ss:$0 sm:$0xff]  ;;  %s305_s12 = scalar_lea.vmem %s712_s7, %s503_s11 }
  0x10   : > { %v308_v3 = vld [vmem:[%s299_s14] sm:$0xff]  ;;  %v309_v4 = vld [vmem:[%s299_s14 + $0x8] sm:$0xff] }
  0x11   : > { %v310_v5 = vpack.c.bf16 %v309_v4, %v308_v3  ;;  %v565_v18 = vld [vmem:[%s709_s4] ss:$0 sm:$0xff] }
  0x12   : > { %342 = vmatpush.bf16.msra.mxu0 %v534_v2  ;;  %397 = vmatpush.bf16.msra.mxu1 %v538_v7  ;;  %v566_v21 = vld [vmem:[%s710_s5] ss:$0 sm:$0xff] }
  0x13   : > { %v567_v30 = vld [vmem:[#allocation2] ss:$0 sm:$0xff] }
  0x15   : > { %514 = vmatmul.msk.bf16.vlgmr.msra.gmra.mxu0 %vm331_vm0, %v310_v5 }
  0x16   : > { %398 = vmatpush.bf16.msra.mxu1 %v537_v8 }
  0x1a   : > { %399 = vmatpush.bf16.msra.mxu1 %v536_v9 }
  0x92   : > { %v344_v10 = vpop.f32.mrf.mxu0 }
  0x93   : > { %v345_v12 = vadd.f32 %v564_v11, %v344_v10 }
  0x95   : > { %v349_v15 = vmax.f32 %v345_v12, 0.0 }
  0x9a   : > { %v346_v13 = vpop.f32.mrf.mxu0 }
  0x9b   : > { %v347_v14 = vadd.f32 %v564_v11, %v346_v13 }
  0x9d   : > { %v350_v16 = vmax.f32 %v347_v14, 0.0 }
  0x9f   : > { %v351_v17 = vpack.c.bf16 %v350_v16, %v349_v15 }
  0xa1   : > { %531 = vmatmul.msk.bf16.vlgmr.msra.gmra.mxu1 %vm388_vm1, %v351_v17 }
 0x11e   : > { %v401_v19 = vpop.f32.mrf.mxu1 }
 0x11f   : > { %v402_v20 = vadd.f32 %v565_v18, %v401_v19 }
 0x121   : > { %v406_v22 = vmax.f32 %v402_v20, 0.0 }
 0x123   : > { %v412_v23 = vmul.f32 %v566_v21, %v406_v22 }
 0x125   : > { %v414_v24 = vsel %vm331_vm0, %v412_v23, 0.0 }
 0x126   : > { %v403_v25 = vpop.f32.mrf.mxu1  ;;  %415 = vadd.xlane.f32.xlu0 %v414_v24 }
 0x127   : > { %v404_v26 = vadd.f32 %v565_v18, %v403_v25 }
 0x129   : > { %v407_v27 = vmax.f32 %v404_v26, 0.0 }
 0x12b   : > { %v413_v28 = vmul.f32 %v566_v21, %v407_v27 }
 0x12d   : > { %v417_v29 = vsel %vm331_vm0, %v413_v28, 0.0 }
 0x12e   : > { %418 = vadd.xlane.f32.xlu0 %v417_v29 }
 0x199   : > { %v416_v31 = vpop.xlane.xlu0 %415 }
 0x19a   : > { %v424_v32 = vadd.f32 %v567_v30, %v416_v31 }
 0x19c   : > { %427 = vst.msk [vmem:[%s305_s12] sm:$0xff] %vm426_vm2, %v424_v32 }
 0x1a1   : > { %v419_v33 = vpop.xlane.xlu0 %418 }
 0x1a2   : > { %v425_v34 = vadd.f32 %v567_v30, %v419_v33 }
 0x1a4   : > { %428 = vst.msk [vmem:[%s305_s12 + $0x8] sm:$0xff] %vm426_vm2, %v425_v34 }
 0x1a5 PF: > { %s19_s28 = sadd.s32 1, %s590_s28   ;;  %s713_s26 = smov %s586_s27 }
 0x1a6   : > { %p16_p5 = scmp.ge.s32.totalorder %s19_s28, 6   ;;  %s714_s27 = smov %s716_s6 }
 0x1a8   :  { %18 = sbr.rel (!%p16_p5) target bundleno = 3 (0x3), region = 78 }

</bundles_post_ra>
